<compile_context>
chip_gen: v5e
topology: v5e:2x2
jax: 0.10.0
libtpu: 0.0.40
codegen_flags: <defaults>
</compile_context>

<pallas_src>
import functools

import jax
import jax.numpy as jnp
from jax.experimental import pallas as pl
from jax.experimental.pallas import tpu as pltpu

LANES = 128            # lane width of a vreg; last dim of every tile
MAX_TILE_ROWS = 4096   # 4096*128*4 B = 2 MiB per x tile (4 MiB double-buffered)


# ------------------------------ helpers ----------------------------------- #
def _round_up(a, b):
    return (a + b - 1) // b * b


def _pick_tiling(n):
    """(tile_rows, num_tiles) for the lane-dense (rows, 128) f32 slab."""
    rows = max(pl.cdiv(n, LANES), 1)
    num_tiles = pl.cdiv(rows, MAX_TILE_ROWS)
    tile_r = _round_up(pl.cdiv(rows, num_tiles), 8)
    num_tiles = pl.cdiv(rows, tile_r)
    return tile_r, num_tiles


# ---------------- kernel 1: per-lane min / max / sum partials -------------- #
def _minmax_sum_kernel(x_ref, mn_ref, mx_ref, sm_ref, *, tile_r, n):
    i = pl.program_id(0)
    last = pl.num_programs(0) - 1

    @pl.when(i == 0)
    def _():
        mn_ref[...] = jnp.full_like(mn_ref, jnp.inf)
        mx_ref[...] = jnp.full_like(mx_ref, -jnp.inf)
        sm_ref[...] = jnp.zeros_like(sm_ref)

    x = x_ref[...]

    @pl.when(i < last)                       # full tiles: no masking needed
    def _():
        mn_ref[...] = jnp.minimum(mn_ref[...],
                                  jnp.min(x, axis=0, keepdims=True))
        mx_ref[...] = jnp.maximum(mx_ref[...],
                                  jnp.max(x, axis=0, keepdims=True))
        sm_ref[...] += jnp.sum(x, axis=0, keepdims=True)

    @pl.when(i == last)                      # only the last tile has padding
    def _():
        row = jax.lax.broadcasted_iota(jnp.int32, x.shape, 0)
        lane = jax.lax.broadcasted_iota(jnp.int32, x.shape, 1)
        gidx = (i * tile_r + row) * LANES + lane
        valid = gidx < n
        mn_ref[...] = jnp.minimum(
            mn_ref[...],
            jnp.min(jnp.where(valid, x, jnp.inf), axis=0, keepdims=True))
        mx_ref[...] = jnp.maximum(
            mx_ref[...],
            jnp.max(jnp.where(valid, x, -jnp.inf), axis=0, keepdims=True))
        sm_ref[...] += jnp.sum(jnp.where(valid, x, 0.0), axis=0, keepdims=True)


# ---------------- kernel 2: all Lloyd iterations, fused -------------------- #
def _lloyd_kernel(mn_ref, mx_ref, sm_ref, x_ref, cen_ref, cnt_sc, sum_sc, *,
                  num_clusters, n, n_pad):
    K = num_clusters
    it = pl.program_id(0)
    t = pl.program_id(1)
    num_t = pl.num_programs(1)

    # one-time init: evenly spaced centers over [lo, hi], lane-replicated.
    # TODO(synk): the reference KMeans samples K random data points as initial
    # centroids; we use a deterministic evenly-spaced init over the data range.
    @pl.when(jnp.logical_and(it == 0, t == 0))
    def _():
        lo = jnp.min(mn_ref[...], axis=1, keepdims=True)       # (1, 1)
        hi = jnp.max(mx_ref[...], axis=1, keepdims=True)       # (1, 1)
        rng = hi - lo
        for k in range(K):
            ck = lo + rng * ((k + 0.5) / K)
            cen_ref[k:k + 1, :] = jnp.broadcast_to(ck, (1, LANES))

    # zero the per-iteration accumulators at the first tile of each iteration
    @pl.when(t == 0)
    def _():
        cnt_sc[...] = jnp.zeros_like(cnt_sc)
        sum_sc[...] = jnp.zeros_like(sum_sc)

    # per-tile: accumulate count / sum of x above each centroid midpoint.
    # No validity masking: the zero padding is corrected analytically below.
    x = x_ref[...]
    if K > 1:
        c_rows = [cen_ref[k:k + 1, :] for k in range(K)]        # (1, LANES)
        cnt_parts, sum_parts = [], []
        for j in range(K - 1):
            mid = (c_rows[j] + c_rows[j + 1]) * 0.5             # (1, LANES)
            ge = x >= mid
            cnt_parts.append(jnp.sum(ge.astype(jnp.float32),
                                     axis=0, keepdims=True))
            sum_parts.append(jnp.sum(jnp.where(ge, x, 0.0),
                                     axis=0, keepdims=True))
        cnt_sc[0:K - 1, :] += jnp.concatenate(cnt_parts, axis=0)
        sum_sc[0:K - 1, :] += jnp.concatenate(sum_parts, axis=0)

    # end of iteration: recover per-cluster stats and update centers in-kernel
    @pl.when(t == num_t - 1)
    def _():
        tot_s = jnp.sum(sm_ref[...], axis=1, keepdims=True)     # (1,1) data sum
        n_f = jnp.full((1, 1), float(n), jnp.float32)
        zero = jnp.zeros((1, 1), jnp.float32)
        old = [cen_ref[k:k + 1, :] for k in range(K)]           # (1, LANES)

        ge_cnt, ge_sum = [], []
        for j in range(K - 1):
            c = jnp.sum(cnt_sc[j:j + 1, :], axis=1, keepdims=True)
            s = jnp.sum(sum_sc[j:j + 1, :], axis=1, keepdims=True)
            if n_pad:
                # zero padding adds n_pad counts to every boundary whose
                # midpoint is <= 0 (and nothing to the weighted sums).
                mid = (old[j] + old[j + 1]) * 0.5
                c = c - jnp.where(mid <= 0.0, float(n_pad), 0.0)
            ge_cnt.append(c)
            ge_sum.append(s)

        for k in range(K):
            hi_c = ge_cnt[k - 1] if k > 0 else n_f
            hi_s = ge_sum[k - 1] if k > 0 else tot_s
            lo_c = ge_cnt[k] if k < K - 1 else zero
            lo_s = ge_sum[k] if k < K - 1 else zero
            cnt_k = hi_c - lo_c
            sum_k = hi_s - lo_s
            new_k = jnp.where(cnt_k > 0.5,
                              sum_k / jnp.maximum(cnt_k, 1.0), old[k])
            cen_ref[k:k + 1, :] = jnp.broadcast_to(new_k, (1, LANES))


# ------------------------ kernel 3: quantization --------------------------- #
def _quantize_kernel(x_ref, c_ref, o_ref, *, num_clusters):
    K = num_clusters
    x = x_ref[...]
    c_rows = [c_ref[k:k + 1, :] for k in range(K)]              # lane-replicated
    out = jnp.broadcast_to(c_rows[0], x.shape)                  # NaN -> c[0]
    for j in range(K - 1):
        mid = (c_rows[j] + c_rows[j + 1]) * 0.5
        out = jnp.where(x >= mid, c_rows[j + 1], out)
    o_ref[...] = out.astype(o_ref.dtype)


# ------------------------------ forward ------------------------------------ #
@functools.partial(jax.jit, static_argnums=(1, 2))
def _kmeans_fit_quantize(x, bits, n_iter):
    num_clusters = 2 ** bits
    n_iter = max(int(n_iter), 1)
    shape = x.shape
    orig_dtype = x.dtype

    xf = x.reshape(-1).astype(jnp.float32)
    n = xf.shape[0]
    tile_r, num_tiles = _pick_tiling(n)
    rows_p = tile_r * num_tiles
    n_pad = rows_p * LANES - n
    x2d = jnp.pad(xf, (0, n_pad)).reshape(rows_p, LANES)

    x_spec1 = pl.BlockSpec((tile_r, LANES), lambda t: (t, 0))
    row_spec1 = pl.BlockSpec((1, LANES), lambda t: (0, 0))

    # --- pass 1: per-lane min / max / sum partials ------------------------- #
    mn_p, mx_p, sm_p = pl.pallas_call(
        functools.partial(_minmax_sum_kernel, tile_r=tile_r, n=n),
        out_shape=(jax.ShapeDtypeStruct((1, LANES), jnp.float32),) * 3,
        grid=(num_tiles,),
        in_specs=[x_spec1],
        out_specs=(row_spec1, row_spec1, row_spec1),
        compiler_params=pltpu.CompilerParams(
            dimension_semantics=("arbitrary",)),
    )(x2d)

    # --- pass 2: all Lloyd iterations fused into one pallas_call ----------- #
    # TODO(synk): the reference stops on a centroid-shift tolerance; we run a
    # fixed number of Lloyd iterations instead.
    acc_rows = _round_up(max(num_clusters - 1, 1), 8)
    x_spec2 = pl.BlockSpec((tile_r, LANES), lambda i, t: (t, 0))
    row_spec2 = pl.BlockSpec((1, LANES), lambda i, t: (0, 0))
    centers2d = pl.pallas_call(
        functools.partial(_lloyd_kernel, num_clusters=num_clusters,
                          n=n, n_pad=n_pad),
        out_shape=jax.ShapeDtypeStruct((num_clusters, LANES), jnp.float32),
        grid=(n_iter, num_tiles),
        in_specs=[row_spec2, row_spec2, row_spec2, x_spec2],
        out_specs=pl.BlockSpec((num_clusters, LANES), lambda i, t: (0, 0)),
        scratch_shapes=[pltpu.VMEM((acc_rows, LANES), jnp.float32),
                        pltpu.VMEM((acc_rows, LANES), jnp.float32)],
        compiler_params=pltpu.CompilerParams(
            dimension_semantics=("arbitrary", "arbitrary")),
    )(mn_p, mx_p, sm_p, x2d)

    # --- pass 3: final nearest-centroid quantization ------------------------ #
    q2d = pl.pallas_call(
        functools.partial(_quantize_kernel, num_clusters=num_clusters),
        out_shape=jax.ShapeDtypeStruct((rows_p, LANES), jnp.float32),
        grid=(num_tiles,),
        in_specs=[x_spec1,
                  pl.BlockSpec((num_clusters, LANES), lambda t: (0, 0))],
        out_specs=x_spec1,
        compiler_params=pltpu.CompilerParams(
            dimension_semantics=("parallel",)),
    )(x2d, centers2d)

    centers = centers2d[:, 0]
    q = q2d.reshape(-1)[:n].reshape(shape).astype(orig_dtype)
    return q, centers


class KMeansLayer:
    """Pallas-TPU equivalent of the PyTorch KMeansLayer forward pass."""

    def __init__(self, bits, n_iter=16):
        self.bits = bits
        self.n_iter = n_iter

    def __call__(self, x):
        q, _ = _kmeans_fit_quantize(x, self.bits, self.n_iter)
        return q
    # TODO(synk): the custom backward (gradient k-means quantization) of
    # KMeansFunction is not implemented; forward only.


# --------------------------- pure-JAX reference ---------------------------- #
def _kmeans_ref(x, bits, n_iter):
    num_clusters = 2 ** bits
    xf = x.reshape(-1).astype(jnp.float32)
    lo, hi = jnp.min(xf), jnp.max(xf)
    c = lo + (jnp.arange(num_clusters, dtype=jnp.float32) + 0.5) \
        / num_clusters * (hi - lo)
    for _ in range(n_iter):
        lab = jnp.argmin(jnp.square(xf[:, None] - c[None, :]), axis=1)
        sums = jnp.zeros((num_clusters,), jnp.float32).at[lab].add(xf)
        cnts = jnp.zeros((num_clusters,), jnp.float32).at[lab].add(1.0)
        c = jnp.where(cnts > 0, sums / jnp.maximum(cnts, 1.0), c)
    lab = jnp.argmin(jnp.square(xf[:, None] - c[None, :]), axis=1)
    return c[lab].reshape(x.shape), c


if __name__ == "__main__":
    BITS = 2          # 2**2 = 4 quantization levels
    N_ITER = 16

    key = jax.random.PRNGKey(0)
    x = jax.random.normal(key, (2, 4, 16, 16), dtype=jnp.float32)

    q, centers = _kmeans_fit_quantize(x, BITS, N_ITER)
    q = jax.block_until_ready(q)

    assert q.shape == x.shape
    assert bool(jnp.all(jnp.isfinite(q)))
    # the quantized output takes at most 2**bits distinct values
    assert int(jnp.unique(q).shape[0]) <= 2 ** BITS

    # cross-check against a pure-JAX Lloyd reference with the same init
    q_exp, c_exp = _kmeans_ref(x, BITS, N_ITER)
    assert bool(jnp.allclose(jnp.sort(centers), jnp.sort(c_exp),
                             rtol=1e-3, atol=1e-3))
    assert float(jnp.mean(jnp.abs(q - q_exp))) < 1e-2

    print("KERNEL_OK")
</pallas_src>

<mosaic_0001>
module attributes {stable_mosaic.version = 11 : i64} {
  func.func @_quantize_kernel(%arg0: i32, %arg1: memref<16x128xf32, #tpu.memory_space<vmem>>, %arg2: memref<4x128xf32, #tpu.memory_space<vmem>>, %arg3: memref<16x128xf32, #tpu.memory_space<vmem>>) attributes {dimension_semantics = [#tpu.dimension_semantics<parallel>], iteration_bounds = array<i64: 1>, scalar_prefetch = 0 : i64, scratch_operands = 0 : i64, tpu.core_type = #tpu.core_type<tc>, window_params = [{transform_indices = @transform_0, window_bounds = array<i64: 16, 128>}, {pipeline_mode = #tpu.pipeline_mode<synchronous>, transform_indices = @transform_1, window_bounds = array<i64: 4, 128>}, {transform_indices = @transform_2, window_bounds = array<i64: 16, 128>}]} {
    %c0 = arith.constant 0 : index
    %c0_0 = arith.constant 0 : index
    %0 = vector.load %arg1[%c0, %c0_0] : memref<16x128xf32, #tpu.memory_space<vmem>>, vector<16x128xf32>
    %c0_1 = arith.constant 0 : index
    %c0_2 = arith.constant 0 : index
    %1 = vector.load %arg2[%c0_1, %c0_2] : memref<4x128xf32, #tpu.memory_space<vmem>>, vector<1x128xf32>
    %c1 = arith.constant 1 : index
    %c0_3 = arith.constant 0 : index
    %2 = vector.load %arg2[%c1, %c0_3] : memref<4x128xf32, #tpu.memory_space<vmem>>, vector<1x128xf32>
    %c2 = arith.constant 2 : index
    %c0_4 = arith.constant 0 : index
    %3 = vector.load %arg2[%c2, %c0_4] : memref<4x128xf32, #tpu.memory_space<vmem>>, vector<1x128xf32>
    %c3 = arith.constant 3 : index
    %c0_5 = arith.constant 0 : index
    %4 = vector.load %arg2[%c3, %c0_5] : memref<4x128xf32, #tpu.memory_space<vmem>>, vector<1x128xf32>
    %5 = vector.shape_cast %1 : vector<1x128xf32> to vector<1x128xf32>
    %6 = vector.broadcast %5 : vector<1x128xf32> to vector<16x128xf32>
    %7 = arith.addf %1, %2 : vector<1x128xf32>
    %cst = arith.constant 5.000000e-01 : f32
    %8 = vector.broadcast %cst : f32 to vector<1x128xf32>
    %9 = arith.mulf %7, %8 : vector<1x128xf32>
    %10 = vector.broadcast %9 : vector<1x128xf32> to vector<16x128xf32>
    %11 = arith.cmpf oge, %0, %10 : vector<16x128xf32>
    %12 = vector.shape_cast %2 : vector<1x128xf32> to vector<1x128xf32>
    %13 = vector.broadcast %12 : vector<1x128xf32> to vector<16x128xf32>
    %14 = arith.select %11, %13, %6 : vector<16x128xi1>, vector<16x128xf32>
    %15 = arith.addf %2, %3 : vector<1x128xf32>
    %cst_6 = arith.constant 5.000000e-01 : f32
    %16 = vector.broadcast %cst_6 : f32 to vector<1x128xf32>
    %17 = arith.mulf %15, %16 : vector<1x128xf32>
    %18 = vector.broadcast %17 : vector<1x128xf32> to vector<16x128xf32>
    %19 = arith.cmpf oge, %0, %18 : vector<16x128xf32>
    %20 = vector.shape_cast %3 : vector<1x128xf32> to vector<1x128xf32>
    %21 = vector.broadcast %20 : vector<1x128xf32> to vector<16x128xf32>
    %22 = arith.select %19, %21, %14 : vector<16x128xi1>, vector<16x128xf32>
    %23 = arith.addf %3, %4 : vector<1x128xf32>
    %cst_7 = arith.constant 5.000000e-01 : f32
    %24 = vector.broadcast %cst_7 : f32 to vector<1x128xf32>
    %25 = arith.mulf %23, %24 : vector<1x128xf32>
    %26 = vector.broadcast %25 : vector<1x128xf32> to vector<16x128xf32>
    %27 = arith.cmpf oge, %0, %26 : vector<16x128xf32>
    %28 = vector.shape_cast %4 : vector<1x128xf32> to vector<1x128xf32>
    %29 = vector.broadcast %28 : vector<1x128xf32> to vector<16x128xf32>
    %30 = arith.select %27, %29, %22 : vector<16x128xi1>, vector<16x128xf32>
    %c0_8 = arith.constant 0 : index
    %c0_9 = arith.constant 0 : index
    %31 = vector.load %arg3[%c0_8, %c0_9] : memref<16x128xf32, #tpu.memory_space<vmem>>, vector<16x128xf32>
    tpu.vector_store %arg3[%c0_8, %c0_9], %30 {strides = array<i32>} : memref<16x128xf32, #tpu.memory_space<vmem>>, vector<16x128xf32>,
    return
  }
  func.func @transform_0(%arg0: i32) -> (i32, i32) {
    %c0_i32 = arith.constant 0 : i32
    %c0_i32_0 = arith.constant 0 : i32
    return %arg0, %c0_i32 : i32, i32
  }
  func.func @transform_1(%arg0: i32) -> (i32, i32) {
    %c0_i32 = arith.constant 0 : i32
    %c0_i32_0 = arith.constant 0 : i32
    %c0_i32_1 = arith.constant 0 : i32
    return %c0_i32, %c0_i32_0 : i32, i32
  }
  func.func @transform_2(%arg0: i32) -> (i32, i32) {
    %c0_i32 = arith.constant 0 : i32
    %c0_i32_0 = arith.constant 0 : i32
    return %arg0, %c0_i32 : i32, i32
  }
}

module attributes {stable_mosaic.version = 11 : i64} {
  func.func @_minmax_sum_kernel(%arg0: i32, %arg1: memref<16x128xf32, #tpu.memory_space<vmem>>, %arg2: memref<1x128xf32, #tpu.memory_space<vmem>>, %arg3: memref<1x128xf32, #tpu.memory_space<vmem>>, %arg4: memref<1x128xf32, #tpu.memory_space<vmem>>) attributes {dimension_semantics = [#tpu.dimension_semantics<arbitrary>], iteration_bounds = array<i64: 1>, scalar_prefetch = 0 : i64, scratch_operands = 0 : i64, tpu.core_type = #tpu.core_type<tc>, window_params = [{transform_indices = @transform_0, window_bounds = array<i64: 16, 128>}, {pipeline_mode = #tpu.pipeline_mode<synchronous>, transform_indices = @transform_1, window_bounds = array<i64: 1, 128>}, {pipeline_mode = #tpu.pipeline_mode<synchronous>, transform_indices = @transform_2, window_bounds = array<i64: 1, 128>}, {pipeline_mode = #tpu.pipeline_mode<synchronous>, transform_indices = @transform_3, window_bounds = array<i64: 1, 128>}]} {
    %c0_i32 = arith.constant 0 : i32
    %0 = arith.cmpi eq, %arg0, %c0_i32 : i32
    %1 = arith.extui %0 : i1 to i32
    %c0_i32_0 = arith.constant 0 : i32
    %2 = arith.cmpi ne, %1, %c0_i32_0 : i32
    scf.if %2 {
      %cst = arith.constant 0x7F800000 : f32
      %10 = vector.broadcast %cst : f32 to vector<1x128xf32>
      %c0_6 = arith.constant 0 : index
      %c0_7 = arith.constant 0 : index
      %11 = vector.load %arg2[%c0_6, %c0_7] : memref<1x128xf32, #tpu.memory_space<vmem>>, vector<1x128xf32>
      tpu.vector_store %arg2[%c0_6, %c0_7], %10 {strides = array<i32>} : memref<1x128xf32, #tpu.memory_space<vmem>>, vector<1x128xf32>,
      %cst_8 = arith.constant 0xFF800000 : f32
      %12 = vector.broadcast %cst_8 : f32 to vector<1x128xf32>
      %c0_9 = arith.constant 0 : index
      %c0_10 = arith.constant 0 : index
      %13 = vector.load %arg3[%c0_9, %c0_10] : memref<1x128xf32, #tpu.memory_space<vmem>>, vector<1x128xf32>
      tpu.vector_store %arg3[%c0_9, %c0_10], %12 {strides = array<i32>} : memref<1x128xf32, #tpu.memory_space<vmem>>, vector<1x128xf32>,
      %cst_11 = arith.constant 0.000000e+00 : f32
      %14 = vector.broadcast %cst_11 : f32 to vector<1x128xf32>
      %c0_12 = arith.constant 0 : index
      %c0_13 = arith.constant 0 : index
      %15 = vector.load %arg4[%c0_12, %c0_13] : memref<1x128xf32, #tpu.memory_space<vmem>>, vector<1x128xf32>
      tpu.vector_store %arg4[%c0_12, %c0_13], %14 {strides = array<i32>} : memref<1x128xf32, #tpu.memory_space<vmem>>, vector<1x128xf32>,
    } else {
    }
    %c0 = arith.constant 0 : index
    %c0_1 = arith.constant 0 : index
    %3 = vector.load %arg1[%c0, %c0_1] : memref<16x128xf32, #tpu.memory_space<vmem>>, vector<16x128xf32>
    %c0_i32_2 = arith.constant 0 : i32
    %4 = arith.cmpi slt, %arg0, %c0_i32_2 : i32
    %5 = arith.extui %4 : i1 to i32
    %c0_i32_3 = arith.constant 0 : i32
    %6 = arith.cmpi ne, %5, %c0_i32_3 : i32
    scf.if %6 {
      %c0_6 = arith.constant 0 : index
      %c0_7 = arith.constant 0 : index
      %10 = vector.load %arg2[%c0_6, %c0_7] : memref<1x128xf32, #tpu.memory_space<vmem>>, vector<1x128xf32>
      %cst = arith.constant dense<0x7F800000> : vector<128xf32>
      %11 = vector.multi_reduction <minimumf>, %3, %cst [0] : vector<16x128xf32> to vector<128xf32>
      %12 = vector.shape_cast %11 : vector<128xf32> to vector<1x128xf32>
      %13 = arith.minimumf %10, %12 : vector<1x128xf32>
      %c0_8 = arith.constant 0 : index
      %c0_9 = arith.constant 0 : index
      %14 = vector.load %arg2[%c0_8, %c0_9] : memref<1x128xf32, #tpu.memory_space<vmem>>, vector<1x128xf32>
      tpu.vector_store %arg2[%c0_8, %c0_9], %13 {strides = array<i32>} : memref<1x128xf32, #tpu.memory_space<vmem>>, vector<1x128xf32>,
      %c0_10 = arith.constant 0 : index
      %c0_11 = arith.constant 0 : index
      %15 = vector.load %arg3[%c0_10, %c0_11] : memref<1x128xf32, #tpu.memory_space<vmem>>, vector<1x128xf32>
      %cst_12 = arith.constant dense<0xFF800000> : vector<128xf32>
      %16 = vector.multi_reduction <maximumf>, %3, %cst_12 [0] : vector<16x128xf32> to vector<128xf32>
      %17 = vector.shape_cast %16 : vector<128xf32> to vector<1x128xf32>
      %18 = arith.maximumf %15, %17 : vector<1x128xf32>
      %c0_13 = arith.constant 0 : index
      %c0_14 = arith.constant 0 : index
      %19 = vector.load %arg3[%c0_13, %c0_14] : memref<1x128xf32, #tpu.memory_space<vmem>>, vector<1x128xf32>
      tpu.vector_store %arg3[%c0_13, %c0_14], %18 {strides = array<i32>} : memref<1x128xf32, #tpu.memory_space<vmem>>, vector<1x128xf32>,
      %c0_15 = arith.constant 0 : index
      %c0_16 = arith.constant 0 : index
      %20 = vector.load %arg4[%c0_15, %c0_16] : memref<1x128xf32, #tpu.memory_space<vmem>>, vector<1x128xf32>
      %cst_17 = arith.constant dense<0.000000e+00> : vector<128xf32>
      %21 = vector.multi_reduction <add>, %3, %cst_17 [0] : vector<16x128xf32> to vector<128xf32>
      %22 = vector.shape_cast %21 : vector<128xf32> to vector<1x128xf32>
      %23 = arith.addf %20, %22 : vector<1x128xf32>
      %c0_18 = arith.constant 0 : index
      %c0_19 = arith.constant 0 : index
      %24 = vector.load %arg4[%c0_18, %c0_19] : memref<1x128xf32, #tpu.memory_space<vmem>>, vector<1x128xf32>
      tpu.vector_store %arg4[%c0_18, %c0_19], %23 {strides = array<i32>} : memref<1x128xf32, #tpu.memory_space<vmem>>, vector<1x128xf32>,
    } else {
    }
    %c0_i32_4 = arith.constant 0 : i32
    %7 = arith.cmpi eq, %arg0, %c0_i32_4 : i32
    %8 = arith.extui %7 : i1 to i32
    %c0_i32_5 = arith.constant 0 : i32
    %9 = arith.cmpi ne, %8, %c0_i32_5 : i32
    scf.if %9 {
      %10 = tpu.iota {dimensions = array<i32: 0>} : vector<16x128xi32>
      %11 = tpu.iota {dimensions = array<i32: 1>} : vector<16x128xi32>
      %c16_i32 = arith.constant 16 : i32
      %12 = arith.muli %arg0, %c16_i32 : i32
      %13 = vector.broadcast %12 : i32 to vector<16x128xi32>
      %14 = arith.addi %13, %10 : vector<16x128xi32>
      %c128_i32 = arith.constant 128 : i32
      %15 = vector.broadcast %c128_i32 : i32 to vector<16x128xi32>
      %16 = arith.muli %14, %15 : vector<16x128xi32>
      %17 = arith.addi %16, %11 : vector<16x128xi32>
      %c2048_i32 = arith.constant 2048 : i32
      %18 = vector.broadcast %c2048_i32 : i32 to vector<16x128xi32>
      %19 = arith.cmpi slt, %17, %18 : vector<16x128xi32>
      %c0_6 = arith.constant 0 : index
      %c0_7 = arith.constant 0 : index
      %20 = vector.load %arg2[%c0_6, %c0_7] : memref<1x128xf32, #tpu.memory_space<vmem>>, vector<1x128xf32>
      %cst = arith.constant 0x7F800000 : f32
      %21 = vector.broadcast %cst : f32 to vector<16x128xf32>
      %22 = arith.select %19, %3, %21 : vector<16x128xi1>, vector<16x128xf32>
      %cst_8 = arith.constant dense<0x7F800000> : vector<128xf32>
      %23 = vector.multi_reduction <minimumf>, %22, %cst_8 [0] : vector<16x128xf32> to vector<128xf32>
      %24 = vector.shape_cast %23 : vector<128xf32> to vector<1x128xf32>
      %25 = arith.minimumf %20, %24 : vector<1x128xf32>
      %c0_9 = arith.constant 0 : index
      %c0_10 = arith.constant 0 : index
      %26 = vector.load %arg2[%c0_9, %c0_10] : memref<1x128xf32, #tpu.memory_space<vmem>>, vector<1x128xf32>
      tpu.vector_store %arg2[%c0_9, %c0_10], %25 {strides = array<i32>} : memref<1x128xf32, #tpu.memory_space<vmem>>, vector<1x128xf32>,
      %c0_11 = arith.constant 0 : index
      %c0_12 = arith.constant 0 : index
      %27 = vector.load %arg3[%c0_11, %c0_12] : memref<1x128xf32, #tpu.memory_space<vmem>>, vector<1x128xf32>
      %cst_13 = arith.constant 0xFF800000 : f32
      %28 = vector.broadcast %cst_13 : f32 to vector<16x128xf32>
      %29 = arith.select %19, %3, %28 : vector<16x128xi1>, vector<16x128xf32>
      %cst_14 = arith.constant dense<0xFF800000> : vector<128xf32>
      %30 = vector.multi_reduction <maximumf>, %29, %cst_14 [0] : vector<16x128xf32> to vector<128xf32>
      %31 = vector.shape_cast %30 : vector<128xf32> to vector<1x128xf32>
      %32 = arith.maximumf %27, %31 : vector<1x128xf32>
      %c0_15 = arith.constant 0 : index
      %c0_16 = arith.constant 0 : index
      %33 = vector.load %arg3[%c0_15, %c0_16] : memref<1x128xf32, #tpu.memory_space<vmem>>, vector<1x128xf32>
      tpu.vector_store %arg3[%c0_15, %c0_16], %32 {strides = array<i32>} : memref<1x128xf32, #tpu.memory_space<vmem>>, vector<1x128xf32>,
      %c0_17 = arith.constant 0 : index
      %c0_18 = arith.constant 0 : index
      %34 = vector.load %arg4[%c0_17, %c0_18] : memref<1x128xf32, #tpu.memory_space<vmem>>, vector<1x128xf32>
      %cst_19 = arith.constant 0.000000e+00 : f32
      %35 = vector.broadcast %cst_19 : f32 to vector<16x128xf32>
      %36 = arith.select %19, %3, %35 : vector<16x128xi1>, vector<16x128xf32>
      %cst_20 = arith.constant dense<0.000000e+00> : vector<128xf32>
      %37 = vector.multi_reduction <add>, %36, %cst_20 [0] : vector<16x128xf32> to vector<128xf32>
      %38 = vector.shape_cast %37 : vector<128xf32> to vector<1x128xf32>
      %39 = arith.addf %34, %38 : vector<1x128xf32>
      %c0_21 = arith.constant 0 : index
      %c0_22 = arith.constant 0 : index
      %40 = vector.load %arg4[%c0_21, %c0_22] : memref<1x128xf32, #tpu.memory_space<vmem>>, vector<1x128xf32>
      tpu.vector_store %arg4[%c0_21, %c0_22], %39 {strides = array<i32>} : memref<1x128xf32, #tpu.memory_space<vmem>>, vector<1x128xf32>,
    } else {
    }
    return
  }
  func.func @transform_0(%arg0: i32) -> (i32, i32) {
    %c0_i32 = arith.constant 0 : i32
    %c0_i32_0 = arith.constant 0 : i32
    return %arg0, %c0_i32 : i32, i32
  }
  func.func @transform_1(%arg0: i32) -> (i32, i32) {
    %c0_i32 = arith.constant 0 : i32
    %c0_i32_0 = arith.constant 0 : i32
    %c0_i32_1 = arith.constant 0 : i32
    return %c0_i32, %c0_i32_0 : i32, i32
  }
  func.func @transform_2(%arg0: i32) -> (i32, i32) {
    %c0_i32 = arith.constant 0 : i32
    %c0_i32_0 = arith.constant 0 : i32
    %c0_i32_1 = arith.constant 0 : i32
    return %c0_i32, %c0_i32_0 : i32, i32
  }
  func.func @transform_3(%arg0: i32) -> (i32, i32) {
    %c0_i32 = arith.constant 0 : i32
    %c0_i32_0 = arith.constant 0 : i32
    %c0_i32_1 = arith.constant 0 : i32
    return %c0_i32, %c0_i32_0 : i32, i32
  }
}

module attributes {stable_mosaic.version = 11 : i64} {
  func.func @_lloyd_kernel(%arg0: i32, %arg1: i32, %arg2: memref<1x128xf32, #tpu.memory_space<vmem>>, %arg3: memref<1x128xf32, #tpu.memory_space<vmem>>, %arg4: memref<1x128xf32, #tpu.memory_space<vmem>>, %arg5: memref<16x128xf32, #tpu.memory_space<vmem>>, %arg6: memref<4x128xf32, #tpu.memory_space<vmem>>, %arg7: memref<8x128xf32, #tpu.memory_space<vmem>>, %arg8: memref<8x128xf32, #tpu.memory_space<vmem>>) attributes {dimension_semantics = [#tpu.dimension_semantics<arbitrary>, #tpu.dimension_semantics<arbitrary>], iteration_bounds = array<i64: 16, 1>, scalar_prefetch = 0 : i64, scratch_operands = 2 : i64, tpu.core_type = #tpu.core_type<tc>, window_params = [{pipeline_mode = #tpu.pipeline_mode<synchronous>, transform_indices = @transform_0, window_bounds = array<i64: 1, 128>}, {pipeline_mode = #tpu.pipeline_mode<synchronous>, transform_indices = @transform_1, window_bounds = array<i64: 1, 128>}, {pipeline_mode = #tpu.pipeline_mode<synchronous>, transform_indices = @transform_2, window_bounds = array<i64: 1, 128>}, {transform_indices = @transform_3, window_bounds = array<i64: 16, 128>}, {pipeline_mode = #tpu.pipeline_mode<synchronous>, transform_indices = @transform_4, window_bounds = array<i64: 4, 128>}]} {
    %c0_i32 = arith.constant 0 : i32
    %0 = arith.cmpi eq, %arg0, %c0_i32 : i32
    %c0_i32_0 = arith.constant 0 : i32
    %1 = arith.cmpi eq, %arg1, %c0_i32_0 : i32
    %2 = arith.andi %0, %1 : i1
    %3 = arith.extui %2 : i1 to i32
    %c0_i32_1 = arith.constant 0 : i32
    %4 = arith.cmpi ne, %3, %c0_i32_1 : i32
    scf.if %4 {
      %c0_31 = arith.constant 0 : index
      %c0_32 = arith.constant 0 : index
      %63 = vector.load %arg2[%c0_31, %c0_32] : memref<1x128xf32, #tpu.memory_space<vmem>>, vector<1x128xf32>
      %cst_33 = arith.constant dense<0x7F800000> : vector<1xf32>
      %64 = vector.multi_reduction <minimumf>, %63, %cst_33 [1] : vector<1x128xf32> to vector<1xf32>
      %65 = vector.shape_cast %64 : vector<1xf32> to vector<1x1xf32>
      %c0_34 = arith.constant 0 : index
      %c0_35 = arith.constant 0 : index
      %66 = vector.load %arg3[%c0_34, %c0_35] : memref<1x128xf32, #tpu.memory_space<vmem>>, vector<1x128xf32>
      %cst_36 = arith.constant dense<0xFF800000> : vector<1xf32>
      %67 = vector.multi_reduction <maximumf>, %66, %cst_36 [1] : vector<1x128xf32> to vector<1xf32>
      %68 = vector.shape_cast %67 : vector<1xf32> to vector<1x1xf32>
      %69 = arith.subf %68, %65 : vector<1x1xf32>
      %cst_37 = arith.constant 1.250000e-01 : f32
      %70 = vector.broadcast %cst_37 : f32 to vector<1x1xf32>
      %71 = arith.mulf %69, %70 : vector<1x1xf32>
      %72 = arith.addf %65, %71 : vector<1x1xf32>
      %73 = vector.shape_cast %72 : vector<1x1xf32> to vector<1x1xf32>
      %74 = vector.broadcast %73 : vector<1x1xf32> to vector<1x128xf32>
      %c0_38 = arith.constant 0 : index
      %c0_39 = arith.constant 0 : index
      %75 = vector.load %arg6[%c0_38, %c0_39] : memref<4x128xf32, #tpu.memory_space<vmem>>, vector<1x128xf32>
      tpu.vector_store %arg6[%c0_38, %c0_39], %74 {strides = array<i32>} : memref<4x128xf32, #tpu.memory_space<vmem>>, vector<1x128xf32>,
      %cst_40 = arith.constant 3.750000e-01 : f32
      %76 = vector.broadcast %cst_40 : f32 to vector<1x1xf32>
      %77 = arith.mulf %69, %76 : vector<1x1xf32>
      %78 = arith.addf %65, %77 : vector<1x1xf32>
      %79 = vector.shape_cast %78 : vector<1x1xf32> to vector<1x1xf32>
      %80 = vector.broadcast %79 : vector<1x1xf32> to vector<1x128xf32>
      %c1_41 = arith.constant 1 : index
      %c0_42 = arith.constant 0 : index
      %81 = vector.load %arg6[%c1_41, %c0_42] : memref<4x128xf32, #tpu.memory_space<vmem>>, vector<1x128xf32>
      tpu.vector_store %arg6[%c1_41, %c0_42], %80 {strides = array<i32>} : memref<4x128xf32, #tpu.memory_space<vmem>>, vector<1x128xf32>,
      %cst_43 = arith.constant 6.250000e-01 : f32
      %82 = vector.broadcast %cst_43 : f32 to vector<1x1xf32>
      %83 = arith.mulf %69, %82 : vector<1x1xf32>
      %84 = arith.addf %65, %83 : vector<1x1xf32>
      %85 = vector.shape_cast %84 : vector<1x1xf32> to vector<1x1xf32>
      %86 = vector.broadcast %85 : vector<1x1xf32> to vector<1x128xf32>
      %c2_44 = arith.constant 2 : index
      %c0_45 = arith.constant 0 : index
      %87 = vector.load %arg6[%c2_44, %c0_45] : memref<4x128xf32, #tpu.memory_space<vmem>>, vector<1x128xf32>
      tpu.vector_store %arg6[%c2_44, %c0_45], %86 {strides = array<i32>} : memref<4x128xf32, #tpu.memory_space<vmem>>, vector<1x128xf32>,
      %cst_46 = arith.constant 8.750000e-01 : f32
      %88 = vector.broadcast %cst_46 : f32 to vector<1x1xf32>
      %89 = arith.mulf %69, %88 : vector<1x1xf32>
      %90 = arith.addf %65, %89 : vector<1x1xf32>
      %91 = vector.shape_cast %90 : vector<1x1xf32> to vector<1x1xf32>
      %92 = vector.broadcast %91 : vector<1x1xf32> to vector<1x128xf32>
      %c3_47 = arith.constant 3 : index
      %c0_48 = arith.constant 0 : index
      %93 = vector.load %arg6[%c3_47, %c0_48] : memref<4x128xf32, #tpu.memory_space<vmem>>, vector<1x128xf32>
      tpu.vector_store %arg6[%c3_47, %c0_48], %92 {strides = array<i32>} : memref<4x128xf32, #tpu.memory_space<vmem>>, vector<1x128xf32>,
    } else {
    }
    %c0_i32_2 = arith.constant 0 : i32
    %5 = arith.cmpi eq, %arg1, %c0_i32_2 : i32
    %6 = arith.extui %5 : i1 to i32
    %c0_i32_3 = arith.constant 0 : i32
    %7 = arith.cmpi ne, %6, %c0_i32_3 : i32
    scf.if %7 {
      %cst_31 = arith.constant 0.000000e+00 : f32
      %63 = vector.broadcast %cst_31 : f32 to vector<8x128xf32>
      %c0_32 = arith.constant 0 : index
      %c0_33 = arith.constant 0 : index
      %64 = vector.load %arg7[%c0_32, %c0_33] : memref<8x128xf32, #tpu.memory_space<vmem>>, vector<8x128xf32>
      tpu.vector_store %arg7[%c0_32, %c0_33], %63 {strides = array<i32>} : memref<8x128xf32, #tpu.memory_space<vmem>>, vector<8x128xf32>,
      %cst_34 = arith.constant 0.000000e+00 : f32
      %65 = vector.broadcast %cst_34 : f32 to vector<8x128xf32>
      %c0_35 = arith.constant 0 : index
      %c0_36 = arith.constant 0 : index
      %66 = vector.load %arg8[%c0_35, %c0_36] : memref<8x128xf32, #tpu.memory_space<vmem>>, vector<8x128xf32>
      tpu.vector_store %arg8[%c0_35, %c0_36], %65 {strides = array<i32>} : memref<8x128xf32, #tpu.memory_space<vmem>>, vector<8x128xf32>,
    } else {
    }
    %c0 = arith.constant 0 : index
    %c0_4 = arith.constant 0 : index
    %8 = vector.load %arg5[%c0, %c0_4] : memref<16x128xf32, #tpu.memory_space<vmem>>, vector<16x128xf32>
    %c0_5 = arith.constant 0 : index
    %c0_6 = arith.constant 0 : index
    %9 = vector.load %arg6[%c0_5, %c0_6] : memref<4x128xf32, #tpu.memory_space<vmem>>, vector<1x128xf32>
    %c1 = arith.constant 1 : index
    %c0_7 = arith.constant 0 : index
    %10 = vector.load %arg6[%c1, %c0_7] : memref<4x128xf32, #tpu.memory_space<vmem>>, vector<1x128xf32>
    %c2 = arith.constant 2 : index
    %c0_8 = arith.constant 0 : index
    %11 = vector.load %arg6[%c2, %c0_8] : memref<4x128xf32, #tpu.memory_space<vmem>>, vector<1x128xf32>
    %c3 = arith.constant 3 : index
    %c0_9 = arith.constant 0 : index
    %12 = vector.load %arg6[%c3, %c0_9] : memref<4x128xf32, #tpu.memory_space<vmem>>, vector<1x128xf32>
    %13 = arith.addf %9, %10 : vector<1x128xf32>
    %cst = arith.constant 5.000000e-01 : f32
    %14 = vector.broadcast %cst : f32 to vector<1x128xf32>
    %15 = arith.mulf %13, %14 : vector<1x128xf32>
    %16 = vector.broadcast %15 : vector<1x128xf32> to vector<16x128xf32>
    %17 = arith.cmpf oge, %8, %16 : vector<16x128xf32>
    %18 = arith.extui %17 : vector<16x128xi1> to vector<16x128xi32>
    %19 = arith.sitofp %18 : vector<16x128xi32> to vector<16x128xf32>
    %cst_10 = arith.constant dense<0.000000e+00> : vector<128xf32>
    %20 = vector.multi_reduction <add>, %19, %cst_10 [0] : vector<16x128xf32> to vector<128xf32>
    %21 = vector.shape_cast %20 : vector<128xf32> to vector<1x128xf32>
    %cst_11 = arith.constant 0.000000e+00 : f32
    %22 = vector.broadcast %cst_11 : f32 to vector<16x128xf32>
    %23 = arith.select %17, %8, %22 : vector<16x128xi1>, vector<16x128xf32>
    %cst_12 = arith.constant dense<0.000000e+00> : vector<128xf32>
    %24 = vector.multi_reduction <add>, %23, %cst_12 [0] : vector<16x128xf32> to vector<128xf32>
    %25 = vector.shape_cast %24 : vector<128xf32> to vector<1x128xf32>
    %26 = arith.addf %10, %11 : vector<1x128xf32>
    %cst_13 = arith.constant 5.000000e-01 : f32
    %27 = vector.broadcast %cst_13 : f32 to vector<1x128xf32>
    %28 = arith.mulf %26, %27 : vector<1x128xf32>
    %29 = vector.broadcast %28 : vector<1x128xf32> to vector<16x128xf32>
    %30 = arith.cmpf oge, %8, %29 : vector<16x128xf32>
    %31 = arith.extui %30 : vector<16x128xi1> to vector<16x128xi32>
    %32 = arith.sitofp %31 : vector<16x128xi32> to vector<16x128xf32>
    %cst_14 = arith.constant dense<0.000000e+00> : vector<128xf32>
    %33 = vector.multi_reduction <add>, %32, %cst_14 [0] : vector<16x128xf32> to vector<128xf32>
    %34 = vector.shape_cast %33 : vector<128xf32> to vector<1x128xf32>
    %cst_15 = arith.constant 0.000000e+00 : f32
    %35 = vector.broadcast %cst_15 : f32 to vector<16x128xf32>
    %36 = arith.select %30, %8, %35 : vector<16x128xi1>, vector<16x128xf32>
    %cst_16 = arith.constant dense<0.000000e+00> : vector<128xf32>
    %37 = vector.multi_reduction <add>, %36, %cst_16 [0] : vector<16x128xf32> to vector<128xf32>
    %38 = vector.shape_cast %37 : vector<128xf32> to vector<1x128xf32>
    %39 = arith.addf %11, %12 : vector<1x128xf32>
    %cst_17 = arith.constant 5.000000e-01 : f32
    %40 = vector.broadcast %cst_17 : f32 to vector<1x128xf32>
    %41 = arith.mulf %39, %40 : vector<1x128xf32>
    %42 = vector.broadcast %41 : vector<1x128xf32> to vector<16x128xf32>
    %43 = arith.cmpf oge, %8, %42 : vector<16x128xf32>
    %44 = arith.extui %43 : vector<16x128xi1> to vector<16x128xi32>
    %45 = arith.sitofp %44 : vector<16x128xi32> to vector<16x128xf32>
    %cst_18 = arith.constant dense<0.000000e+00> : vector<128xf32>
    %46 = vector.multi_reduction <add>, %45, %cst_18 [0] : vector<16x128xf32> to vector<128xf32>
    %47 = vector.shape_cast %46 : vector<128xf32> to vector<1x128xf32>
    %cst_19 = arith.constant 0.000000e+00 : f32
    %48 = vector.broadcast %cst_19 : f32 to vector<16x128xf32>
    %49 = arith.select %43, %8, %48 : vector<16x128xi1>, vector<16x128xf32>
    %cst_20 = arith.constant dense<0.000000e+00> : vector<128xf32>
    %50 = vector.multi_reduction <add>, %49, %cst_20 [0] : vector<16x128xf32> to vector<128xf32>
    %51 = vector.shape_cast %50 : vector<128xf32> to vector<1x128xf32>
    %c0_21 = arith.constant 0 : index
    %c0_22 = arith.constant 0 : index
    %52 = vector.load %arg7[%c0_21, %c0_22] : memref<8x128xf32, #tpu.memory_space<vmem>>, vector<3x128xf32>
    %53 = tpu.concatenate %21, %34, %47 in 0 : vector<1x128xf32>, vector<1x128xf32>, vector<1x128xf32> -> vector<3x128xf32>
    %54 = arith.addf %52, %53 : vector<3x128xf32>
    %c0_23 = arith.constant 0 : index
    %c0_24 = arith.constant 0 : index
    %55 = vector.load %arg7[%c0_23, %c0_24] : memref<8x128xf32, #tpu.memory_space<vmem>>, vector<3x128xf32>
    tpu.vector_store %arg7[%c0_23, %c0_24], %54 {strides = array<i32>} : memref<8x128xf32, #tpu.memory_space<vmem>>, vector<3x128xf32>,
    %c0_25 = arith.constant 0 : index
    %c0_26 = arith.constant 0 : index
    %56 = vector.load %arg8[%c0_25, %c0_26] : memref<8x128xf32, #tpu.memory_space<vmem>>, vector<3x128xf32>
    %57 = tpu.concatenate %25, %38, %51 in 0 : vector<1x128xf32>, vector<1x128xf32>, vector<1x128xf32> -> vector<3x128xf32>
    %58 = arith.addf %56, %57 : vector<3x128xf32>
    %c0_27 = arith.constant 0 : index
    %c0_28 = arith.constant 0 : index
    %59 = vector.load %arg8[%c0_27, %c0_28] : memref<8x128xf32, #tpu.memory_space<vmem>>, vector<3x128xf32>
    tpu.vector_store %arg8[%c0_27, %c0_28], %58 {strides = array<i32>} : memref<8x128xf32, #tpu.memory_space<vmem>>, vector<3x128xf32>,
    %c0_i32_29 = arith.constant 0 : i32
    %60 = arith.cmpi eq, %arg1, %c0_i32_29 : i32
    %61 = arith.extui %60 : i1 to i32
    %c0_i32_30 = arith.constant 0 : i32
    %62 = arith.cmpi ne, %61, %c0_i32_30 : i32
    scf.if %62 {
      %c0_31 = arith.constant 0 : index
      %c0_32 = arith.constant 0 : index
      %63 = vector.load %arg4[%c0_31, %c0_32] : memref<1x128xf32, #tpu.memory_space<vmem>>, vector<1x128xf32>
      %cst_33 = arith.constant dense<0.000000e+00> : vector<1xf32>
      %64 = vector.multi_reduction <add>, %63, %cst_33 [1] : vector<1x128xf32> to vector<1xf32>
      %65 = vector.shape_cast %64 : vector<1xf32> to vector<1x1xf32>
      %cst_34 = arith.constant 2.048000e+03 : f32
      %66 = vector.broadcast %cst_34 : f32 to vector<1x1xf32>
      %cst_35 = arith.constant 0.000000e+00 : f32
      %67 = vector.broadcast %cst_35 : f32 to vector<1x1xf32>
      %c0_36 = arith.constant 0 : index
      %c0_37 = arith.constant 0 : index
      %68 = vector.load %arg6[%c0_36, %c0_37] : memref<4x128xf32, #tpu.memory_space<vmem>>, vector<1x128xf32>
      %c1_38 = arith.constant 1 : index
      %c0_39 = arith.constant 0 : index
      %69 = vector.load %arg6[%c1_38, %c0_39] : memref<4x128xf32, #tpu.memory_space<vmem>>, vector<1x128xf32>
      %c2_40 = arith.constant 2 : index
      %c0_41 = arith.constant 0 : index
      %70 = vector.load %arg6[%c2_40, %c0_41] : memref<4x128xf32, #tpu.memory_space<vmem>>, vector<1x128xf32>
      %c3_42 = arith.constant 3 : index
      %c0_43 = arith.constant 0 : index
      %71 = vector.load %arg6[%c3_42, %c0_43] : memref<4x128xf32, #tpu.memory_space<vmem>>, vector<1x128xf32>
      %c0_44 = arith.constant 0 : index
      %c0_45 = arith.constant 0 : index
      %72 = vector.load %arg7[%c0_44, %c0_45] : memref<8x128xf32, #tpu.memory_space<vmem>>, vector<1x128xf32>
      %cst_46 = arith.constant dense<0.000000e+00> : vector<1xf32>
      %73 = vector.multi_reduction <add>, %72, %cst_46 [1] : vector<1x128xf32> to vector<1xf32>
      %74 = vector.shape_cast %73 : vector<1xf32> to vector<1x1xf32>
      %c0_47 = arith.constant 0 : index
      %c0_48 = arith.constant 0 : index
      %75 = vector.load %arg8[%c0_47, %c0_48] : memref<8x128xf32, #tpu.memory_space<vmem>>, vector<1x128xf32>
      %cst_49 = arith.constant dense<0.000000e+00> : vector<1xf32>
      %76 = vector.multi_reduction <add>, %75, %cst_49 [1] : vector<1x128xf32> to vector<1xf32>
      %77 = vector.shape_cast %76 : vector<1xf32> to vector<1x1xf32>
      %c1_50 = arith.constant 1 : index
      %c0_51 = arith.constant 0 : index
      %78 = vector.load %arg7[%c1_50, %c0_51] : memref<8x128xf32, #tpu.memory_space<vmem>>, vector<1x128xf32>
      %cst_52 = arith.constant dense<0.000000e+00> : vector<1xf32>
      %79 = vector.multi_reduction <add>, %78, %cst_52 [1] : vector<1x128xf32> to vector<1xf32>
      %80 = vector.shape_cast %79 : vector<1xf32> to vector<1x1xf32>
      %c1_53 = arith.constant 1 : index
      %c0_54 = arith.constant 0 : index
      %81 = vector.load %arg8[%c1_53, %c0_54] : memref<8x128xf32, #tpu.memory_space<vmem>>, vector<1x128xf32>
      %cst_55 = arith.constant dense<0.000000e+00> : vector<1xf32>
      %82 = vector.multi_reduction <add>, %81, %cst_55 [1] : vector<1x128xf32> to vector<1xf32>
      %83 = vector.shape_cast %82 : vector<1xf32> to vector<1x1xf32>
      %c2_56 = arith.constant 2 : index
      %c0_57 = arith.constant 0 : index
      %84 = vector.load %arg7[%c2_56, %c0_57] : memref<8x128xf32, #tpu.memory_space<vmem>>, vector<1x128xf32>
      %cst_58 = arith.constant dense<0.000000e+00> : vector<1xf32>
      %85 = vector.multi_reduction <add>, %84, %cst_58 [1] : vector<1x128xf32> to vector<1xf32>
      %86 = vector.shape_cast %85 : vector<1xf32> to vector<1x1xf32>
      %c2_59 = arith.constant 2 : index
      %c0_60 = arith.constant 0 : index
      %87 = vector.load %arg8[%c2_59, %c0_60] : memref<8x128xf32, #tpu.memory_space<vmem>>, vector<1x128xf32>
      %cst_61 = arith.constant dense<0.000000e+00> : vector<1xf32>
      %88 = vector.multi_reduction <add>, %87, %cst_61 [1] : vector<1x128xf32> to vector<1xf32>
      %89 = vector.shape_cast %88 : vector<1xf32> to vector<1x1xf32>
      %90 = arith.subf %66, %74 : vector<1x1xf32>
      %91 = arith.subf %65, %77 : vector<1x1xf32>
      %cst_62 = arith.constant 5.000000e-01 : f32
      %92 = vector.broadcast %cst_62 : f32 to vector<1x1xf32>
      %93 = arith.cmpf ogt, %90, %92 : vector<1x1xf32>
      %cst_63 = arith.constant 1.000000e+00 : f32
      %94 = vector.broadcast %cst_63 : f32 to vector<1x1xf32>
      %95 = arith.maximumf %90, %94 : vector<1x1xf32>
      %96 = arith.divf %91, %95 : vector<1x1xf32>
      %97 = vector.shape_cast %93 : vector<1x1xi1> to vector<1x1xi1>
      %98 = vector.broadcast %97 : vector<1x1xi1> to vector<1x128xi1>
      %99 = vector.shape_cast %96 : vector<1x1xf32> to vector<1x1xf32>
      %100 = vector.broadcast %99 : vector<1x1xf32> to vector<1x128xf32>
      %101 = arith.select %98, %100, %68 : vector<1x128xi1>, vector<1x128xf32>
      %c0_64 = arith.constant 0 : index
      %c0_65 = arith.constant 0 : index
      %102 = vector.load %arg6[%c0_64, %c0_65] : memref<4x128xf32, #tpu.memory_space<vmem>>, vector<1x128xf32>
      tpu.vector_store %arg6[%c0_64, %c0_65], %101 {strides = array<i32>} : memref<4x128xf32, #tpu.memory_space<vmem>>, vector<1x128xf32>,
      %103 = arith.subf %74, %80 : vector<1x1xf32>
      %104 = arith.subf %77, %83 : vector<1x1xf32>
      %cst_66 = arith.constant 5.000000e-01 : f32
      %105 = vector.broadcast %cst_66 : f32 to vector<1x1xf32>
      %106 = arith.cmpf ogt, %103, %105 : vector<1x1xf32>
      %cst_67 = arith.constant 1.000000e+00 : f32
      %107 = vector.broadcast %cst_67 : f32 to vector<1x1xf32>
      %108 = arith.maximumf %103, %107 : vector<1x1xf32>
      %109 = arith.divf %104, %108 : vector<1x1xf32>
      %110 = vector.shape_cast %106 : vector<1x1xi1> to vector<1x1xi1>
      %111 = vector.broadcast %110 : vector<1x1xi1> to vector<1x128xi1>
      %112 = vector.shape_cast %109 : vector<1x1xf32> to vector<1x1xf32>
      %113 = vector.broadcast %112 : vector<1x1xf32> to vector<1x128xf32>
      %114 = arith.select %111, %113, %69 : vector<1x128xi1>, vector<1x128xf32>
      %c1_68 = arith.constant 1 : index
      %c0_69 = arith.constant 0 : index
      %115 = vector.load %arg6[%c1_68, %c0_69] : memref<4x128xf32, #tpu.memory_space<vmem>>, vector<1x128xf32>
      tpu.vector_store %arg6[%c1_68, %c0_69], %114 {strides = array<i32>} : memref<4x128xf32, #tpu.memory_space<vmem>>, vector<1x128xf32>,
      %116 = arith.subf %80, %86 : vector<1x1xf32>
      %117 = arith.subf %83, %89 : vector<1x1xf32>
      %cst_70 = arith.constant 5.000000e-01 : f32
      %118 = vector.broadcast %cst_70 : f32 to vector<1x1xf32>
      %119 = arith.cmpf ogt, %116, %118 : vector<1x1xf32>
      %cst_71 = arith.constant 1.000000e+00 : f32
      %120 = vector.broadcast %cst_71 : f32 to vector<1x1xf32>
      %121 = arith.maximumf %116, %120 : vector<1x1xf32>
      %122 = arith.divf %117, %121 : vector<1x1xf32>
      %123 = vector.shape_cast %119 : vector<1x1xi1> to vector<1x1xi1>
      %124 = vector.broadcast %123 : vector<1x1xi1> to vector<1x128xi1>
      %125 = vector.shape_cast %122 : vector<1x1xf32> to vector<1x1xf32>
      %126 = vector.broadcast %125 : vector<1x1xf32> to vector<1x128xf32>
      %127 = arith.select %124, %126, %70 : vector<1x128xi1>, vector<1x128xf32>
      %c2_72 = arith.constant 2 : index
      %c0_73 = arith.constant 0 : index
      %128 = vector.load %arg6[%c2_72, %c0_73] : memref<4x128xf32, #tpu.memory_space<vmem>>, vector<1x128xf32>
      tpu.vector_store %arg6[%c2_72, %c0_73], %127 {strides = array<i32>} : memref<4x128xf32, #tpu.memory_space<vmem>>, vector<1x128xf32>,
      %129 = arith.subf %86, %67 : vector<1x1xf32>
      %130 = arith.subf %89, %67 : vector<1x1xf32>
      %cst_74 = arith.constant 5.000000e-01 : f32
      %131 = vector.broadcast %cst_74 : f32 to vector<1x1xf32>
      %132 = arith.cmpf ogt, %129, %131 : vector<1x1xf32>
      %cst_75 = arith.constant 1.000000e+00 : f32
      %133 = vector.broadcast %cst_75 : f32 to vector<1x1xf32>
      %134 = arith.maximumf %129, %133 : vector<1x1xf32>
      %135 = arith.divf %130, %134 : vector<1x1xf32>
      %136 = vector.shape_cast %132 : vector<1x1xi1> to vector<1x1xi1>
      %137 = vector.broadcast %136 : vector<1x1xi1> to vector<1x128xi1>
      %138 = vector.shape_cast %135 : vector<1x1xf32> to vector<1x1xf32>
      %139 = vector.broadcast %138 : vector<1x1xf32> to vector<1x128xf32>
      %140 = arith.select %137, %139, %71 : vector<1x128xi1>, vector<1x128xf32>
      %c3_76 = arith.constant 3 : index
      %c0_77 = arith.constant 0 : index
      %141 = vector.load %arg6[%c3_76, %c0_77] : memref<4x128xf32, #tpu.memory_space<vmem>>, vector<1x128xf32>
      tpu.vector_store %arg6[%c3_76, %c0_77], %140 {strides = array<i32>} : memref<4x128xf32, #tpu.memory_space<vmem>>, vector<1x128xf32>,
    } else {
    }
    return
  }
  func.func @transform_0(%arg0: i32, %arg1: i32) -> (i32, i32) {
    %c0_i32 = arith.constant 0 : i32
    %c0_i32_0 = arith.constant 0 : i32
    %c0_i32_1 = arith.constant 0 : i32
    return %c0_i32, %c0_i32_0 : i32, i32
  }
  func.func @transform_1(%arg0: i32, %arg1: i32) -> (i32, i32) {
    %c0_i32 = arith.constant 0 : i32
    %c0_i32_0 = arith.constant 0 : i32
    %c0_i32_1 = arith.constant 0 : i32
    return %c0_i32, %c0_i32_0 : i32, i32
  }
  func.func @transform_2(%arg0: i32, %arg1: i32) -> (i32, i32) {
    %c0_i32 = arith.constant 0 : i32
    %c0_i32_0 = arith.constant 0 : i32
    %c0_i32_1 = arith.constant 0 : i32
    return %c0_i32, %c0_i32_0 : i32, i32
  }
  func.func @transform_3(%arg0: i32, %arg1: i32) -> (i32, i32) {
    %c0_i32 = arith.constant 0 : i32
    %c0_i32_0 = arith.constant 0 : i32
    return %arg1, %c0_i32 : i32, i32
  }
  func.func @transform_4(%arg0: i32, %arg1: i32) -> (i32, i32) {
    %c0_i32 = arith.constant 0 : i32
    %c0_i32_0 = arith.constant 0 : i32
    %c0_i32_1 = arith.constant 0 : i32
    return %c0_i32, %c0_i32_0 : i32, i32
  }
}

</mosaic_0001>

<bundles_post_ra>
// kernel: _kmeans_fit_quantize.5
= control target key start
LH: loop header
LB: loop body
LE: loop exit
PB: predicated region body
PF: predicated region fallthrough
CT: control target
= control target key end

     0   :  { %s103_s1 = inlined_call_operand.vmem [shape: f32[4,128], index: 1, kind: input, shape index: {}]   ;;  %s104_s0 = inlined_call_operand.vmem [shape: f32[16,128], index: 0, kind: input, shape index: {}]   ;;  %s105_s2 = inlined_call_operand.vmem [shape: f32[16,128], index: 2, kind: output, shape index: {}]  }
   0x1   :  { %v13_v0 = vld [vmem:[%s103_s1] sm:$0x1]  ;;  %v14_v1 = vld [vmem:[%s103_s1 + $0x1] sm:$0x1]  ;;  %v15_v2 = vld [vmem:[%s103_s1 + $0x2] sm:$0x1] }
   0x2   :  { %v16_v3 = vld [vmem:[%s103_s1 + $0x3] sm:$0x1]  ;;  %v18_v4 = vadd.f32 %v14_v1, %v13_v0  ;;  %v26_v5 = vadd.f32 %v15_v2, %v14_v1  ;;  %v48_v7 = vld [vmem:[%s103_s1] ss:$0 sm:$0xff]  ;;  %v49_v10 = vld [vmem:[%s103_s1 + $0x1] ss:$0 sm:$0xff] }
   0x3   :  { %v34_v6 = vadd.f32 %v16_v3, %v15_v2  ;;  %v11_v9 = vld [vmem:[%s104_s0] sm:$0xff]  ;;  %v12_v13 = vld [vmem:[%s104_s0 + $0x8] sm:$0xff] }
   0x4   :  { %v19_v8 = vmul.f32 0.5, %v18_v4  ;;  %v27_v11 = vmul.f32 0.5, %v26_v5  ;;  %v50_v15 = vld [vmem:[%s103_s1 + $0x2] ss:$0 sm:$0xff]  ;;  %v51_v18 = vld [vmem:[%s103_s1 + $0x3] ss:$0 sm:$0xff] }
   0x5   :  { %v35_v12 = vmul.f32 0.5, %v34_v6 }
   0x6   :  { %v20_v14 = vperm.slane %v19_v8, 0  ;;  %v28_v16 = vperm.slane %v27_v11, 0 }
   0x7   :  { %v36_v17 = vperm.slane %v35_v12, 0 }
   0x8   :  { %vm21_vm0 = vcmp.ge.f32.partialorder %v11_v9, %v20_v14  ;;  %vm22_vm1 = vcmp.ge.f32.partialorder %v12_v13, %v20_v14  ;;  %vm29_vm2 = vcmp.ge.f32.partialorder %v11_v9, %v28_v16  ;;  %vm30_vm4 = vcmp.ge.f32.partialorder %v12_v13, %v28_v16 }
   0x9   :  { %v24_v19 = vsel %vm21_vm0, %v49_v10, %v48_v7  ;;  %vm37_vm3 = vcmp.ge.f32.partialorder %v11_v9, %v36_v17  ;;  %v25_v20 = vsel %vm22_vm1, %v49_v10, %v48_v7  ;;  %vm38_vm5 = vcmp.ge.f32.partialorder %v12_v13, %v36_v17 }
   0xa   :  { %v32_v21 = vsel %vm29_vm2, %v50_v15, %v24_v19  ;;  %v33_v23 = vsel %vm30_vm4, %v50_v15, %v25_v20 }
   0xb   :  { %v40_v22 = vsel %vm37_vm3, %v51_v18, %v32_v21  ;;  %v41_v24 = vsel %vm38_vm5, %v51_v18, %v33_v23 }
   0xc   :  { %42 = vst [vmem:[%s105_s2] sm:$0xff] %v40_v22 }
   0xd   :  { %43 = vst [vmem:[%s105_s2 + $0x8] sm:$0xff] %v41_v24 }

// kernel: _kmeans_fit_quantize.3
= control target key start
LH: loop header
LB: loop body
LE: loop exit
PB: predicated region body
PF: predicated region fallthrough
CT: control target
= control target key end

     0   :  { %v57_v0 = vlaneseq  ;;  %v123_v1 = vmov inf   ;;  %v124_v2 = vmov -inf   ;;  %v125_v5 = vmov 0.0   ;;  %s179_s1 = inlined_call_operand.vmem [shape: f32[1,128], index: 1, kind: output, shape index: {0}]   ;;  %s180_s2 = inlined_call_operand.vmem [shape: f32[1,128], index: 2, kind: output, shape index: {1}]   ;;  %s181_s3 = inlined_call_operand.vmem [shape: f32[1,128], index: 3, kind: output, shape index: {2}]   ;;  %s182_s0 = inlined_call_operand.vmem [shape: f32[16,128], index: 0, kind: input, shape index: {}]  }
   0x1   :  { %15 = vst [vmem:[%s179_s1] sm:$0x1] %v123_v1  ;;  %v18_v8 = vld [vmem:[%s182_s0] sm:$0xff]  ;;  %v19_v11 = vld [vmem:[%s182_s0 + $0x8] sm:$0xff] }
   0x2   :  { %16 = vst [vmem:[%s180_s2] sm:$0x1] %v124_v2  ;;  %v58_v3 = vshrl.u32 %v57_v0, 7  ;;  %v61_v4 = vand.u32 127, %v57_v0 }
   0x3   :  { %17 = vst [vmem:[%s181_s3] sm:$0x1] %v125_v5 }
   0x4   :  { %v59_v6 = vadd.s32 8, %v58_v3  ;;  %v66_v7 = vmul.u32 128, %v58_v3 }
   0x6   :  { %v67_v9 = vmul.u32 128, %v59_v6  ;;  %v68_v10 = vadd.s32 %v66_v7, %v61_v4 }
   0x8   :  { %v69_v12 = vadd.s32 %v67_v9, %v61_v4  ;;  %vm70_vm0 = vcmp.lt.s32.totalorder %v68_v10, 2048  ;;  %v72_v37 = vld [vmem:[%s179_s1] sm:$0x1] }
   0x9   :  { %v73_v13 = vsel %vm70_vm0, %v18_v8, inf  ;;  %v85_v14 = vsel %vm70_vm0, %v18_v8, -inf  ;;  %v97_v15 = vsel %vm70_vm0, %v18_v8, 0.0  ;;  %v84_v38 = vld [vmem:[%s180_s2] sm:$0x1] }
   0xa   :  { %vm71_vm1 = vcmp.lt.s32.totalorder %v69_v12, 2048  ;;  %v96_v39 = vld [vmem:[%s181_s3] sm:$0x1] }
   0xb   :  { %v74_v16 = vsel %vm71_vm1, %v19_v11, inf  ;;  %v86_v17 = vsel %vm71_vm1, %v19_v11, -inf  ;;  %v98_v18 = vsel %vm71_vm1, %v19_v11, 0.0 }
   0xc   :  { %v75_v19 = vmin.f32 %v73_v13, %v74_v16  ;;  %v87_v20 = vmax.f32 %v85_v14, %v86_v17  ;;  %v99_v21 = vadd.f32 %v98_v18, %v97_v15 }
   0xe   :  { %v76_v22 = vrot.slane %v75_v19, 4  ;;  %v88_v23 = vrot.slane %v87_v20, 4  ;;  %v100_v24 = vrot.slane %v99_v21, 4 }
  0x10   :  { %v77_v25 = vmin.f32 %v75_v19, %v76_v22  ;;  %v89_v26 = vmax.f32 %v87_v20, %v88_v23  ;;  %v101_v27 = vadd.f32 %v100_v24, %v99_v21 }
  0x12   :  { %v78_v28 = vrot.slane %v77_v25, 2  ;;  %v90_v29 = vrot.slane %v89_v26, 2  ;;  %v102_v30 = vrot.slane %v101_v27, 2 }
  0x14   :  { %v79_v31 = vmin.f32 %v77_v25, %v78_v28  ;;  %v91_v32 = vmax.f32 %v89_v26, %v90_v29  ;;  %v103_v33 = vadd.f32 %v102_v30, %v101_v27 }
  0x16   :  { %v80_v34 = vrot.slane %v79_v31, 1  ;;  %v92_v35 = vrot.slane %v91_v32, 1  ;;  %v104_v36 = vrot.slane %v103_v33, 1 }
  0x18   :  { %v81_v40 = vmin.f32 %v79_v31, %v80_v34  ;;  %v93_v41 = vmax.f32 %v91_v32, %v92_v35  ;;  %v105_v42 = vadd.f32 %v104_v36, %v103_v33 }
  0x1a   :  { %v82_v43 = vmin.f32 %v72_v37, %v81_v40  ;;  %v94_v44 = vmax.f32 %v84_v38, %v93_v41  ;;  %v106_v45 = vadd.f32 %v105_v42, %v96_v39 }
  0x1c   :  { %83 = vst [vmem:[%s179_s1] sm:$0x1] %v82_v43 }
  0x1d   :  { %95 = vst [vmem:[%s180_s2] sm:$0x1] %v94_v44 }
  0x1e   :  { %107 = vst [vmem:[%s181_s3] sm:$0x1] %v106_v45 }

// kernel: _kmeans_fit_quantize.4
= control target key start
LH: loop header
LB: loop body
LE: loop exit
PB: predicated region body
PF: predicated region fallthrough
CT: control target
= control target key end

     0   :  { %s585_s15 = smov 0   ;;  %s587_s16 = smov 0   ;;  %s761_s0 = inlined_call_operand.vmem [shape: f32[1,128], index: 0, kind: input, shape index: {}]   ;;  %s762_s1 = inlined_call_operand.vmem [shape: f32[1,128], index: 1, kind: input, shape index: {}]   ;;  %s763_s2 = inlined_call_operand.vmem [shape: f32[1,128], index: 2, kind: input, shape index: {}]   ;;  %s764_s3 = inlined_call_operand.vmem [shape: f32[16,128], index: 3, kind: input, shape index: {}]   ;;  %s765_s4 = inlined_call_operand.vmem [shape: f32[4,128], index: 4, kind: output, shape index: {}]  }
   0x1   :  { %s589_s17 = smov 0  }
   0x2 LB: > { %s26_s18 = sadd.s32 1, %s553_s16  ;;  %p491_p0 = scmp.ge.s32.totalorder %s557_s17, 1  ;;  %s557_s17 = sphi %s589_s17, %s14_s17   ;;  %s553_s16 = sphi %s587_s16, %s779_s16   ;;  %s549_s15 = sphi %s585_s15, %s778_s15  }
   0x3   : > { %p28_p1 = scmp.ge.s32.totalorder %s26_s18, 16  ;;  %p170_p2 = scmp.lt.s32.totalorder %s557_s17, 17 }
   0x5   : > { %s781_s18 = smov (%p28_p1, %s26_s18), 0  ;;  %p171_p3 = pnand %p491_p0, %p170_p2 }
   0x6   : > { %p197_p4 = scmp.eq.s32.totalorder (!%p171_p3), %s549_s15, 0 }
   0x7   : > { %174 = sbr.rel (%p171_p3) target bundleno = 340 (0x154), region = 36 }
   0xc   : > { %202 = sbr.rel (!%p197_p4) target bundleno = 148 (0x94), region = 40  ;;  %v203_v0 = vld [vmem:[%s761_s0] sm:$0x1] (%p197_p4)  ;;  %vm204_vm0 = vcmask (%p197_p4), 1040384  }
   0xd   : > { %v205_v1 = vsel (%p197_p4), %vm204_vm0, %v203_v0, inf  ;;  %v208_v2 = vld [vmem:[%s762_s1] sm:$0x1] (%p197_p4) }
   0xe   : > { %206 = vmin.xlane.f32.xlu0 (%p197_p4), %v205_v1  ;;  %v209_v3 = vsel (%p197_p4), %vm204_vm0, %v208_v2, -inf }
  0x16   : > { %210 = vmax.xlane.f32.xlu0 %v209_v3 }
  0x81   : > { %v207_v4 = vpop.xlane.xlu0 %206 }
  0x89   : > { %v211_v5 = vpop.xlane.xlu0 %210 }
  0x8a   : > { %v212_v6 = vsub.f32 %v211_v5, %v207_v4 }
  0x8c   : > { %v213_v7 = vmul.f32 0.125, %v212_v6  ;;  %v216_v8 = vmul.f32 0.375, %v212_v6  ;;  %v219_v9 = vmul.f32 0.625, %v212_v6  ;;  %v222_v10 = vmul.f32 0.875, %v212_v6 }
  0x8e   : > { %v214_v11 = vadd.f32 %v213_v7, %v207_v4  ;;  %v217_v12 = vadd.f32 %v216_v8, %v207_v4  ;;  %v220_v13 = vadd.f32 %v219_v9, %v207_v4  ;;  %v223_v14 = vadd.f32 %v222_v10, %v207_v4 }
  0x90   : > { %215 = vst [vmem:[%s765_s4] sm:$0x1] %v214_v11 }
  0x91   : > { %218 = vst [vmem:[%s765_s4 + $0x1] sm:$0x1] %v217_v12 }
  0x92   : > { %221 = vst [vmem:[%s765_s4 + $0x2] sm:$0x1] %v220_v13 }
  0x93   : > { %224 = vst [vmem:[%s765_s4 + $0x3] sm:$0x1] %v223_v14 }
  0x94 PF: > { %v559_v16 = vmov 0.0   ;;  %v230_v25 = vld [vmem:[%s764_s3] sm:$0xff]  ;;  %v231_v26 = vld [vmem:[%s764_s3 + $0x8] sm:$0xff]  ;;  %vm312_vm7 = vcmask 1040384   ;;  %vm314_vm8 = vcmask 1041408  }
  0x95   : > { %228 = vst [vmem:[#allocation2] sm:$0xff] %v559_v16  ;;  %v326_v41 = vld [vmem:[%s763_s2] sm:$0x1] }
  0x96   : > { %229 = vst [vmem:[#allocation3] sm:$0xff] %v559_v16 }
  0x97   : > { %v232_v15 = vld [vmem:[%s765_s4] sm:$0x1] }
  0x98   : > { %v233_v17 = vld [vmem:[%s765_s4 + $0x1] sm:$0x1] }
  0x99   : > { %v234_v18 = vld [vmem:[%s765_s4 + $0x2] sm:$0x1]  ;;  %v236_v20 = vadd.f32 %v233_v17, %v232_v15 }
  0x9a   : > { %v235_v19 = vld [vmem:[%s765_s4 + $0x3] sm:$0x1]  ;;  %v261_v21 = vadd.f32 %v234_v18, %v233_v17 }
  0x9b   : > { %v286_v22 = vadd.f32 %v235_v19, %v234_v18  ;;  %v237_v23 = vmul.f32 0.5, %v236_v20 }
  0x9c   : > { %v262_v24 = vmul.f32 0.5, %v261_v21 }
  0x9d   : > { %v287_v27 = vmul.f32 0.5, %v286_v22  ;;  %v238_v28 = vperm.slane %v237_v23, 0  ;;  %v311_v22 = vld [vmem:[#allocation2] sm:$0x7]  ;;  %v318_v31 = vld [vmem:[#allocation3] sm:$0x7] }
  0x9e   : > { %v263_v29 = vperm.slane %v262_v24, 0 }
  0x9f   : > { %v288_v30 = vperm.slane %v287_v27, 0  ;;  %vm639_vm1 = vcmp.ge.f32.partialorder %v230_v25, %v238_v28  ;;  %vm643_vm2 = vcmp.ge.f32.partialorder %v231_v26, %v238_v28 }
  0xa0   : > { %vm647_vm3 = vcmp.ge.f32.partialorder %v230_v25, %v263_v29  ;;  %vm651_vm4 = vcmp.ge.f32.partialorder %v231_v26, %v263_v29  ;;  %v493_v35 = vsel %vm639_vm1, 1.0, %v559_v16  ;;  %v494_v36 = vsel %vm643_vm2, 1.0, %v559_v16 }
  0xa1   : > { %v495_v37 = vsel %vm647_vm3, 1.0, %v559_v16  ;;  %v496_v38 = vsel %vm651_vm4, 1.0, %v559_v16  ;;  %v245_v39 = vadd.f32 %v494_v36, %v493_v35  ;;  %vm663_vm5 = vcmp.ge.f32.partialorder %v230_v25, %v288_v30 }
  0xa2   : > { %v270_v40 = vadd.f32 %v496_v38, %v495_v37  ;;  %vm667_vm6 = vcmp.ge.f32.partialorder %v231_v26, %v288_v30  ;;  %v497_v43 = vsel %vm663_vm5, 1.0, %v559_v16  ;;  %v252_v45 = vsel %vm639_vm1, %v230_v25, 0.0 }
  0xa3   : > { %v498_v44 = vsel %vm667_vm6, 1.0, %v559_v16  ;;  %v253_v46 = vsel %vm643_vm2, %v231_v26, 0.0  ;;  %v246_v47 = vrot.slane %v245_v39, 4  ;;  %v277_v51 = vsel %vm647_vm3, %v230_v25, 0.0 }
  0xa4   : > { %v271_v48 = vrot.slane %v270_v40, 4  ;;  %v295_v49 = vadd.f32 %v498_v44, %v497_v43  ;;  %v254_v50 = vadd.f32 %v253_v46, %v252_v45  ;;  %v278_v52 = vsel %vm651_vm4, %v231_v26, 0.0 }
  0xa5   : > { %v302_v53 = vsel %vm663_vm5, %v230_v25, 0.0  ;;  %v303_v54 = vsel %vm667_vm6, %v231_v26, 0.0  ;;  %v247_v55 = vadd.f32 %v246_v47, %v245_v39  ;;  %v279_v59 = vadd.f32 %v278_v52, %v277_v51 }
  0xa6   : > { %v272_v56 = vadd.f32 %v271_v48, %v270_v40  ;;  %v296_v57 = vrot.slane %v295_v49, 4  ;;  %v255_v58 = vrot.slane %v254_v50, 4  ;;  %v304_v60 = vadd.f32 %v303_v54, %v302_v53 }
  0xa7   : > { %v248_v61 = vrot.slane %v247_v55, 2  ;;  %v280_v1 = vrot.slane %v279_v59, 4  ;;  %v327_v44 = vsel %vm312_vm7, %v326_v41, 0.0 }
  0xa8   : > { %v273_v62 = vrot.slane %v272_v56, 2  ;;  %v297_v63 = vadd.f32 %v296_v57, %v295_v49  ;;  %v256_v0 = vadd.f32 %v255_v58, %v254_v50  ;;  %v305_v2 = vrot.slane %v304_v60, 4 }
  0xa9   : > { %v249_v3 = vadd.f32 %v248_v61, %v247_v55  ;;  %v281_v7 = vadd.f32 %v280_v1, %v279_v59 }
  0xaa   : > { %v274_v4 = vadd.f32 %v273_v62, %v272_v56  ;;  %v298_v5 = vrot.slane %v297_v63, 2  ;;  %v257_v6 = vrot.slane %v256_v0, 2  ;;  %v306_v8 = vadd.f32 %v305_v2, %v304_v60 }
  0xab   : > { %v250_v9 = vrot.slane %v249_v3, 1  ;;  %v282_v13 = vrot.slane %v281_v7, 2 }
  0xac   : > { %v275_v10 = vrot.slane %v274_v4, 1  ;;  %v299_v11 = vadd.f32 %v298_v5, %v297_v63  ;;  %v258_v12 = vadd.f32 %v257_v6, %v256_v0  ;;  %v307_v14 = vrot.slane %v306_v8, 2 }
  0xad   : > { %v251_v15 = vadd.f32 %v250_v9, %v249_v3  ;;  %v283_v19 = vadd.f32 %v282_v13, %v281_v7 }
  0xae   : > { %v276_v16 = vadd.f32 %v275_v10, %v274_v4  ;;  %v300_v17 = vrot.slane %v299_v11, 1  ;;  %v259_v18 = vrot.slane %v258_v12, 1  ;;  %v308_v20 = vadd.f32 %v307_v14, %v306_v8 }
  0xaf   : > { %v284_v25 = vrot.slane %v283_v19, 1 }
  0xb0   : > { %v301_v21 = vadd.f32 %v300_v17, %v299_v11  ;;  %v313_v23 = vsel %vm312_vm7, %v251_v15, %v276_v16  ;;  %v260_v24 = vadd.f32 %v259_v18, %v258_v12  ;;  %v309_v26 = vrot.slane %v308_v20, 1 }
  0xb1   : > { %v285_v29 = vadd.f32 %v284_v25, %v283_v19 }
  0xb2   : > { %v315_v27 = vsel %vm314_vm8, %v313_v23, %v301_v21  ;;  %v310_v30 = vadd.f32 %v309_v26, %v308_v20  ;;  %v333_v20 = vld [vmem:[%s765_s4 + $0x3] sm:$0x1] }
  0xb3   : > { %v316_v28 = vadd.f32 %v315_v27, %v311_v22  ;;  %v319_v32 = vsel %vm312_vm7, %v260_v24, %v285_v29  ;;  %v330_v22 = vld [vmem:[%s765_s4] sm:$0x1] }
  0xb4   : > { %v320_v33 = vsel %vm314_vm8, %v319_v32, %v310_v30 }
  0xb5   : > { %317 = vst [vmem:[#allocation2] sm:$0x7] %v316_v28  ;;  %v321_v34 = vadd.f32 %v320_v33, %v318_v31 }
  0xb7   : > { %322 = vst [vmem:[#allocation3] sm:$0x7] %v321_v34 }
  0xbc   : > { %v350_v35 = vld [vmem:[#allocation2 + $0x2] sm:$0x1]  ;;  %v334_v36 = vld [vmem:[#allocation2] sm:$0x1]  ;;  %v342_v39 = vld [vmem:[#allocation2 + $0x1] sm:$0x1] }
  0xbd   : > { %v351_v37 = vsel %vm312_vm7, %v350_v35, 0.0  ;;  %v335_v38 = vsel %vm312_vm7, %v334_v36, 0.0  ;;  %v343_v43 = vsel %vm312_vm7, %v342_v39, 0.0 }
  0xbe   : > { %352 = vadd.xlane.f32.xlu1 %v351_v37  ;;  %336 = vadd.xlane.f32.xlu0 %v335_v38  ;;  %v338_v40 = vld [vmem:[#allocation3] sm:$0x1]  ;;  %v346_v45 = vld [vmem:[#allocation3 + $0x1] sm:$0x1]  ;;  %v354_v47 = vld [vmem:[#allocation3 + $0x2] sm:$0x1] }
  0xbf   : > { %v339_v42 = vsel %vm312_vm7, %v338_v40, 0.0  ;;  %v347_v46 = vsel %vm312_vm7, %v346_v45, 0.0  ;;  %v355_v48 = vsel %vm312_vm7, %v354_v47, 0.0  ;;  %v331_v45 = vld [vmem:[%s765_s4 + $0x1] sm:$0x1] }
  0xc0   : > { %340 = vadd.xlane.f32.xlu2 %v339_v42 }
  0xc6   : > { %344 = vadd.xlane.f32.xlu0 %v343_v43  ;;  %328 = vadd.xlane.f32.xlu1 %v327_v44 }
  0xc8   : > { %348 = vadd.xlane.f32.xlu2 %v347_v46 }
  0xce   : > { %356 = vadd.xlane.f32.xlu0 %v355_v48 }
 0x131   : > { %v353_v49 = vpop.xlane.xlu1 %352  ;;  %v337_v50 = vpop.xlane.xlu0 %336 }
 0x132   : > { %v428_v51 = vmax.f32 %v353_v49, 1.0  ;;  %v358_v52 = vsub.f32 2048.0, %v337_v50  ;;  %vm427_vm1 = vcmp.gt.f32.partialorder %v353_v49, 0.5 }
 0x133   : > { %v713_v2 = vpop.xlane.xlu2 %340 }
 0x134   : > { %527 = vrcp.f32 %v428_v51  ;;  %v361_v53 = vmax.f32 %v358_v52, 1.0  ;;  %vm434_vm9 = vweird.f32 %v428_v51  ;;  %v440_v1 = vand.u32 2147483648, %v428_v51 }
 0x135   : > { %v438_v6 = vand.u32 2147483647, %v428_v51  ;;  %vm360_vm2 = vcmp.gt.f32.partialorder %v358_v52, 0.5 }
 0x136   : > { %529 = vrcp.f32 %v361_v53  ;;  %v373_v4 = vand.u32 2147483648, %v361_v53  ;;  %v371_v8 = vand.u32 2147483647, %v361_v53  ;;  %vm367_vm12 = vweird.f32 %v361_v53 }
 0x137   : > { %v441_v12 = vor.u32 1.1754944e-38, %v440_v1  ;;  %vm439_vm15 = vcmp.eq.f32.partialorder %v438_v6, 8.507059e+37 }
 0x138   : > { %v374_v15 = vor.u32 1.1754944e-38, %v373_v4  ;;  %vm372_vm0 = vcmp.eq.f32.partialorder %v371_v8, 8.507059e+37 }
 0x139   : > { %v345_v54 = vpop.xlane.xlu0 %344  ;;  %v329_v3 = vpop.xlane.xlu1 %328 }
 0x13a   : > { %v528_v55 = vpop.eup %527  ;;  %v701_v56 = vsub.f32 %v337_v50, %v345_v54  ;;  %v703_v57 = vsub.f32 %v345_v54, %v353_v49  ;;  %v359_v10 = vsub.f32 %v329_v3, %v713_v2  ;;  %v332_v49 = vld [vmem:[%s765_s4 + $0x2] sm:$0x1] }
 0x13b   : > { %v430_v58 = vmul.f32 %v528_v55, %v428_v51  ;;  %vm435_vm10 = vweird.f32 %v528_v55  ;;  %v349_v35 = vpop.xlane.xlu2 %348 }
 0x13c   : > { %v530_v59 = vpop.eup %529  ;;  %v706_v60 = vmax.f32 %v701_v56, 1.0  ;;  %v709_v61 = vmax.f32 %v703_v57, 1.0  ;;  %vm436_vm13 = vmor %vm434_vm9, %vm435_vm10  ;;  %v382_v42 = vsub.f32 %v713_v2, %v349_v35 }
 0x13d   : > { %v363_v62 = vmul.f32 %v530_v59, %v361_v53  ;;  %v431_v63 = vsub.f32 1.0, %v430_v58  ;;  %vm368_vm11 = vweird.f32 %v530_v59 }
 0x13e   : > { %531 = vrcp.f32 %v706_v60  ;;  %vm369_vm14 = vmor %vm367_vm12, %vm368_vm11  ;;  %v394_v28 = vand.u32 2147483647, %v706_v60  ;;  %v396_v29 = vand.u32 2147483648, %v706_v60  ;;  %v419_v34 = vand.u32 2147483648, %v709_v61 }
 0x13f   : > { %533 = vrcp.f32 %v709_v61  ;;  %v364_v0 = vsub.f32 1.0, %v363_v62  ;;  %v432_v5 = vmul.f32 %v528_v55, %v431_v63  ;;  %v417_v37 = vand.u32 2147483647, %v709_v61 }
 0x140   : > { %vm390_vm5 = vweird.f32 %v706_v60  ;;  %v397_v39 = vor.u32 1.1754944e-38, %v396_v29  ;;  %vm413_vm7 = vweird.f32 %v709_v61  ;;  %vm395_vm8 = vcmp.eq.f32.partialorder %v394_v28, 8.507059e+37 }
 0x141   : > { %v365_v7 = vmul.f32 %v530_v59, %v364_v0  ;;  %v433_v9 = vadd.f32 %v528_v55, %v432_v5  ;;  %v357_v13 = vpop.xlane.xlu0 %356  ;;  %v420_v44 = vor.u32 1.1754944e-38, %v419_v34  ;;  %vm418_vm10 = vcmp.eq.f32.partialorder %v417_v37, 8.507059e+37 }
 0x142   : > { %v405_v41 = vsub.f32 %v349_v35, %v357_v13  ;;  %vm383_vm11 = vcmp.gt.f32.partialorder %v701_v56, 0.5  ;;  %vm406_vm12 = vcmp.gt.f32.partialorder %v703_v57, 0.5 }
 0x143   : > { %v366_v11 = vadd.f32 %v530_v59, %v365_v7  ;;  %v437_v16 = vsel %vm436_vm13, %v528_v55, %v433_v9 }
 0x144   : > { %v532_v14 = vpop.eup %531  ;;  %v442_v21 = vsel %vm439_vm15, %v441_v12, %v437_v16 }
 0x145   : > { %v534_v17 = vpop.eup %533  ;;  %v386_v18 = vmul.f32 %v532_v14, %v706_v60  ;;  %v370_v19 = vsel %vm369_vm14, %v530_v59, %v366_v11  ;;  %v443_v25 = vmul.f32 %v442_v21, %v357_v13  ;;  %vm391_vm3 = vweird.f32 %v532_v14 }
 0x146   : > { %v375_v23 = vsel %vm372_vm0, %v374_v15, %v370_v19  ;;  %v409_v24 = vmul.f32 %v534_v17, %v709_v61  ;;  %vm414_vm4 = vweird.f32 %v534_v17  ;;  %vm392_vm6 = vmor %vm390_vm5, %vm391_vm3 }
 0x147   : > { %v387_v26 = vsub.f32 1.0, %v386_v18  ;;  %v376_v27 = vmul.f32 %v375_v23, %v359_v10  ;;  %v446_v31 = vsel %vm427_vm1, %v443_v25, %v333_v20  ;;  %vm415_vm9 = vmor %vm413_vm7, %vm414_vm4 }
 0x148   : > { %v410_v30 = vsub.f32 1.0, %v409_v24  ;;  %447 = vst [vmem:[%s765_s4 + $0x3] sm:$0x1] %v446_v31 }
 0x149   : > { %v388_v32 = vmul.f32 %v532_v14, %v387_v26  ;;  %v379_v33 = vsel %vm360_vm2, %v376_v27, %v330_v22 }
 0x14a   : > { %380 = vst [vmem:[%s765_s4] sm:$0x1] %v379_v33  ;;  %v411_v36 = vmul.f32 %v534_v17, %v410_v30 }
 0x14b   : > { %v389_v38 = vadd.f32 %v532_v14, %v388_v32 }
 0x14c   : > { %v412_v40 = vadd.f32 %v534_v17, %v411_v36 }
 0x14d   : > { %v393_v43 = vsel %vm392_vm6, %v532_v14, %v389_v38 }
 0x14e   : > { %v398_v46 = vsel %vm395_vm8, %v397_v39, %v393_v43  ;;  %v416_v47 = vsel %vm415_vm9, %v534_v17, %v412_v40 }
 0x14f   : > { %v399_v48 = vmul.f32 %v398_v46, %v382_v42  ;;  %v421_v50 = vsel %vm418_vm10, %v420_v44, %v416_v47 }
 0x150   : > { %v422_v51 = vmul.f32 %v421_v50, %v405_v41 }
 0x151   : > { %v402_v52 = vsel %vm383_vm11, %v399_v48, %v331_v45 }
 0x152   : > { %403 = vst [vmem:[%s765_s4 + $0x1] sm:$0x1] %v402_v52  ;;  %v425_v53 = vsel %vm406_vm12, %v422_v51, %v332_v49 }
 0x153   : > { %426 = vst [vmem:[%s765_s4 + $0x2] sm:$0x1] %v425_v53 }
 0x154 PF: > { %s14_s17 = sadd.s32 1, %s557_s17   ;;  %s778_s15 = smov %s553_s16 }
 0x155   : > { %p11_p5 = scmp.ge.s32.totalorder %s14_s17, 18   ;;  %s779_s16 = smov %s781_s18 }
 0x157   :  { %13 = sbr.rel (!%p11_p5) target bundleno = 2 (0x2), region = 74 }

</bundles_post_ra>
